<compile_context>
chip_gen: v7x
topology: tpu7x:2x2x1
jax: 0.10.0
libtpu: 0.0.40
codegen_flags: <defaults>
</compile_context>

<pallas_src>
import functools

import jax
import jax.numpy as jnp
import numpy as np
from jax import lax
from jax.experimental import pallas as pl
from jax.experimental.pallas import tpu as pltpu


def _sepconv_kernel(x_ref, wdw_ref, wpw_ref, bpw_ref, out_ref, ext_ref,
                    *, H, W, K, P, Cm):
    # x_ref:   (1, Cm, H*W)         input image, channels on sublanes, flat HW on lanes
    # wdw_ref: (Cm, K*K)            depthwise weights, one column per tap (t = ky*K+kx)
    # wpw_ref: (Cout, Cm)           pointwise weights
    # bpw_ref: (Cout, 1)            depthwise bias folded through the pointwise conv
    # out_ref: (1, Cout, H*W)       lane-dense output
    # ext_ref: (Cm, H*W + 2*halo)   VMEM scratch: input with a zero halo on the flat axis
    HW = H * W
    halo = P * W + P                       # largest |tap shift| on the flattened axis

    # Stage the input into the zero-haloed scratch.  Vertical taps that run off the
    # top/bottom of the image land in the zero halo; horizontal taps that would
    # wrap across image rows are masked below.
    ext_ref[:, :halo] = jnp.zeros((Cm, halo), jnp.float32)
    ext_ref[:, halo + HW:] = jnp.zeros((Cm, halo), jnp.float32)
    ext_ref[:, halo:halo + HW] = x_ref[0].astype(jnp.float32)

    # Column index of every flattened spatial position (for the wrap masks).
    col = lax.broadcasted_iota(jnp.int32, (1, HW), 1) % W

    # Depthwise KxK conv, vectorized over channels: each tap is a shifted lane-dense
    # window of the scratch, scaled by a per-channel weight (statically unrolled).
    acc = None
    for ky in range(K):
        for kx in range(K):
            dy, dx = ky - P, kx - P
            shift = dy * W + dx
            win = ext_ref[:, pl.ds(halo + shift, HW)]              # (Cm, HW)
            if dx < 0:                                             # mask row wrap-around
                win = jnp.where(col >= -dx, win, 0.0)
            elif dx > 0:
                win = jnp.where(col < W - dx, win, 0.0)
            t = ky * K + kx
            term = win * wdw_ref[:, t:t + 1]                       # (Cm, HW) * (Cm, 1)
            acc = term if acc is None else acc + term

    # Pointwise 1x1 conv as a VPU broadcast-MAC over the (tiny) channel dim; the
    # depthwise bias has been pre-folded into bpw in the wrapper.
    # (For large Cm/Cout this should be a jnp.dot on the MXU instead.)
    pw = None
    for c in range(Cm):
        term = acc[c:c + 1, :] * wpw_ref[:, c:c + 1]               # (1, HW) * (Cout, 1)
        pw = term if pw is None else pw + term
    pw = pw + bpw_ref[...]                                         # (Cout, 1) bias

    # ELU (alpha=1).  exp(min(x,0)) - 1 == expm1(x) on the negative branch and never
    # overflows on the (discarded) positive branch.
    neg = jnp.exp(jnp.minimum(pw, 0.0)) - 1.0
    out_ref[0] = jnp.where(pw > 0, pw, neg).astype(out_ref.dtype)


def separable_conv2d_pallas(x_nchw, w_dw, b_dw, w_pw, *, kernel_size=3, padding=1,
                            depth_multiplier=1):
    """
    x_nchw : (N, C_in, H, W)            float32
    w_dw   : (C_in*depth, 1, K, K)      PyTorch depthwise weight layout
    b_dw   : (C_in*depth,)              depthwise bias
    w_pw   : (C_out, C_in*depth, 1, 1)  PyTorch pointwise weight layout
    returns: (N, C_out, H, W)
    """
    N, C_in, H, W = x_nchw.shape
    K, P = kernel_size, padding
    assert K - 1 == 2 * P, "kernel assumes a 'same'-size convolution (2*padding == kernel_size-1)"
    Cm = C_in * depth_multiplier
    Cout = w_pw.shape[0]
    HW = H * W
    halo = P * W + P

    if depth_multiplier != 1:
        # TODO(synk): fold the channel replication into the kernel (index the depthwise
        # weights per output channel) instead of materializing the repeat in HBM.
        x_nchw = jnp.repeat(x_nchw, depth_multiplier, axis=1)

    # Free reshapes only -- no transpose / pad / repeat round-trips.
    x_flat = x_nchw.reshape(N, Cm, HW)
    wdw = w_dw.reshape(Cm, K * K)                       # (Cm, K*K), column t = ky*K + kx
    wpw = w_pw.reshape(Cout, Cm)                        # (Cout, Cm)
    bpw = (wpw @ b_dw).reshape(Cout, 1)                 # depthwise bias folded through 1x1

    kernel = functools.partial(_sepconv_kernel, H=H, W=W, K=K, P=P, Cm=Cm)

    out_flat = pl.pallas_call(
        kernel,
        out_shape=jax.ShapeDtypeStruct((N, Cout, HW), x_nchw.dtype),
        grid_spec=pltpu.PrefetchScalarGridSpec(
            num_scalar_prefetch=0,
            # One grid step per batch image.  At these sizes the whole image is only a
            # few KB of VMEM per step; for large H*W add a row-tile grid axis (with a
            # K-1 halo) to bound per-step VMEM and feed both v7x TensorCores.
            grid=(N,),
            in_specs=[
                pl.BlockSpec((1, Cm, HW), lambda n: (n, 0, 0)),
                pl.BlockSpec((Cm, K * K), lambda n: (0, 0)),
                pl.BlockSpec((Cout, Cm), lambda n: (0, 0)),
                pl.BlockSpec((Cout, 1), lambda n: (0, 0)),
            ],
            out_specs=pl.BlockSpec((1, Cout, HW), lambda n: (n, 0, 0)),
            scratch_shapes=[pltpu.VMEM((Cm, HW + 2 * halo), jnp.float32)],
        ),
        compiler_params=pltpu.CompilerParams(
            dimension_semantics=("parallel",),
            vmem_limit_bytes=32 * 1024 * 1024,
        ),
    )(x_flat, wdw, wpw, bpw)

    return out_flat.reshape(N, Cout, H, W)   # free reshape, no transpose


def _reference(x_nchw, w_dw, b_dw, w_pw, *, padding=1, depth_multiplier=1):
    """Pure-JAX reference matching PyTorch semantics (NCHW / OIHW)."""
    C_in = x_nchw.shape[1]
    dn = ("NCHW", "OIHW", "NCHW")
    dw = lax.conv_general_dilated(
        x_nchw, w_dw, window_strides=(1, 1),
        padding=((padding, padding), (padding, padding)),
        feature_group_count=C_in, dimension_numbers=dn)
    dw = dw + b_dw[None, :, None, None]
    pw = lax.conv_general_dilated(
        dw, w_pw, window_strides=(1, 1), padding=((0, 0), (0, 0)),
        dimension_numbers=dn)
    return jnp.where(pw > 0, pw, jnp.expm1(pw))


if __name__ == "__main__":
    # Small deterministic setup: batch=2, in_channels=4, out_channels=8, 16x16.
    N, C_in, H, W = 2, 4, 16, 16
    C_out, K, pad, depth = 8, 3, 1, 1
    Cm = C_in * depth

    key = jax.random.PRNGKey(0)
    kx, kdw, kbdw, kpw = jax.random.split(key, 4)
    x = jax.random.normal(kx, (N, C_in, H, W), dtype=jnp.float32)
    # Parameter shapes follow nn.Conv2d: depthwise (Cm, 1, K, K) + bias (Cm,);
    # pointwise (C_out, Cm, 1, 1), bias=False.
    w_dw = jax.random.normal(kdw, (Cm, 1, K, K), dtype=jnp.float32) * 0.2
    b_dw = jax.random.normal(kbdw, (Cm,), dtype=jnp.float32) * 0.1
    w_pw = jax.random.normal(kpw, (C_out, Cm, 1, 1), dtype=jnp.float32) * 0.2

    out = separable_conv2d_pallas(x, w_dw, b_dw, w_pw,
                                  kernel_size=K, padding=pad,
                                  depth_multiplier=depth)
    out = jax.block_until_ready(out)

    ref = _reference(x, w_dw, b_dw, w_pw, padding=pad, depth_multiplier=depth)
    np.testing.assert_allclose(np.asarray(out), np.asarray(ref), rtol=1e-5, atol=1e-5)
    assert out.shape == (N, C_out, H, W)
    print("KERNEL_OK")
</pallas_src>

<mosaic_0001>
module attributes {stable_mosaic.version = 11 : i64} {
  func.func @_sepconv_kernel(%arg0: i32, %arg1: memref<1x4x256xf32, #tpu.memory_space<vmem>>, %arg2: memref<4x9xf32, #tpu.memory_space<vmem>>, %arg3: memref<8x4xf32, #tpu.memory_space<vmem>>, %arg4: memref<8x1xf32, #tpu.memory_space<vmem>>, %arg5: memref<1x8x256xf32, #tpu.memory_space<vmem>>, %arg6: memref<4x290xf32, #tpu.memory_space<vmem>>) attributes {dimension_semantics = [#tpu.dimension_semantics<parallel>], iteration_bounds = array<i64: 2>, scalar_prefetch = 0 : i64, scratch_operands = 1 : i64, tpu.core_type = #tpu.core_type<tc>, window_params = [{transform_indices = @transform_0, window_bounds = array<i64: 1, 4, 256>}, {pipeline_mode = #tpu.pipeline_mode<synchronous>, transform_indices = @transform_1, window_bounds = array<i64: 4, 9>}, {pipeline_mode = #tpu.pipeline_mode<synchronous>, transform_indices = @transform_2, window_bounds = array<i64: 8, 4>}, {pipeline_mode = #tpu.pipeline_mode<synchronous>, transform_indices = @transform_3, window_bounds = array<i64: 8, 1>}, {transform_indices = @transform_4, window_bounds = array<i64: 1, 8, 256>}]} {
    %cst = arith.constant 0.000000e+00 : f32
    %0 = vector.broadcast %cst : f32 to vector<4x17xf32>
    %c0 = arith.constant 0 : index
    %c0_0 = arith.constant 0 : index
    %1 = vector.load %arg6[%c0, %c0_0] : memref<4x290xf32, #tpu.memory_space<vmem>>, vector<4x17xf32>
    tpu.vector_store %arg6[%c0, %c0_0], %0 {strides = array<i32>} : memref<4x290xf32, #tpu.memory_space<vmem>>, vector<4x17xf32>,
    %cst_1 = arith.constant 0.000000e+00 : f32
    %2 = vector.broadcast %cst_1 : f32 to vector<4x17xf32>
    %c0_2 = arith.constant 0 : index
    %c273 = arith.constant 273 : index
    %3 = vector.load %arg6[%c0_2, %c273] : memref<4x290xf32, #tpu.memory_space<vmem>>, vector<4x17xf32>
    tpu.vector_store %arg6[%c0_2, %c273], %2 {strides = array<i32>} : memref<4x290xf32, #tpu.memory_space<vmem>>, vector<4x17xf32>,
    %c0_3 = arith.constant 0 : index
    %c0_4 = arith.constant 0 : index
    %c0_5 = arith.constant 0 : index
    %4 = vector.load %arg1[%c0_3, %c0_4, %c0_5] : memref<1x4x256xf32, #tpu.memory_space<vmem>>, vector<1x4x256xf32>
    %5 = vector.shape_cast %4 : vector<1x4x256xf32> to vector<4x256xf32>
    %c0_6 = arith.constant 0 : index
    %c17 = arith.constant 17 : index
    %6 = vector.load %arg6[%c0_6, %c17] : memref<4x290xf32, #tpu.memory_space<vmem>>, vector<4x256xf32>
    tpu.vector_store %arg6[%c0_6, %c17], %5 {strides = array<i32>} : memref<4x290xf32, #tpu.memory_space<vmem>>, vector<4x256xf32>,
    %7 = tpu.iota {dimensions = array<i32: 1>} : vector<1x256xi32>
    %c16_i32 = arith.constant 16 : i32
    %c0_i32 = arith.constant 0 : i32
    %8 = arith.cmpi eq, %c16_i32, %c0_i32 : i32
    %c1_i32 = arith.constant 1 : i32
    %9 = arith.select %8, %c1_i32, %c16_i32 : i32
    %10 = vector.broadcast %9 : i32 to vector<1x256xi32>
    %11 = arith.remsi %7, %10 : vector<1x256xi32>
    %c0_i32_7 = arith.constant 0 : i32
    %12 = vector.broadcast %c0_i32_7 : i32 to vector<1x256xi32>
    %13 = arith.cmpi ne, %11, %12 : vector<1x256xi32>
    %c0_i32_8 = arith.constant 0 : i32
    %14 = vector.broadcast %c0_i32_8 : i32 to vector<1x256xi32>
    %15 = arith.cmpi slt, %11, %14 : vector<1x256xi32>
    %c0_i32_9 = arith.constant 0 : i32
    %16 = arith.cmpi slt, %9, %c0_i32_9 : i32
    %17 = vector.broadcast %16 : i1 to vector<1x256xi1>
    %18 = vector.broadcast %17 : vector<1x256xi1> to vector<1x256xi1>
    %19 = arith.xori %15, %18 : vector<1x256xi1>
    %20 = arith.andi %19, %13 : vector<1x256xi1>
    %21 = vector.broadcast %9 : i32 to vector<1x256xi32>
    %22 = arith.addi %11, %21 : vector<1x256xi32>
    %23 = arith.select %20, %22, %11 : vector<1x256xi1>, vector<1x256xi32>
    %c0_10 = arith.constant 0 : index
    %c0_11 = arith.constant 0 : index
    %24 = vector.load %arg6[%c0_10, %c0_11] : memref<4x290xf32, #tpu.memory_space<vmem>>, vector<4x256xf32>
    %c1_i32_12 = arith.constant 1 : i32
    %25 = vector.broadcast %c1_i32_12 : i32 to vector<1x256xi32>
    %26 = arith.cmpi sge, %23, %25 : vector<1x256xi32>
    %cst_13 = arith.constant 0.000000e+00 : f32
    %27 = vector.shape_cast %26 : vector<1x256xi1> to vector<1x256xi1>
    %28 = vector.broadcast %27 : vector<1x256xi1> to vector<4x256xi1>
    %29 = vector.broadcast %cst_13 : f32 to vector<4x256xf32>
    %30 = arith.select %28, %24, %29 : vector<4x256xi1>, vector<4x256xf32>
    %c0_14 = arith.constant 0 : index
    %c0_15 = arith.constant 0 : index
    %31 = vector.load %arg2[%c0_14, %c0_15] : memref<4x9xf32, #tpu.memory_space<vmem>>, vector<4x1xf32>
    %32 = vector.broadcast %31 : vector<4x1xf32> to vector<4x256xf32>
    %33 = arith.mulf %30, %32 : vector<4x256xf32>
    %c0_16 = arith.constant 0 : index
    %c1 = arith.constant 1 : index
    %34 = vector.load %arg6[%c0_16, %c1] : memref<4x290xf32, #tpu.memory_space<vmem>>, vector<4x256xf32>
    %c0_17 = arith.constant 0 : index
    %c1_18 = arith.constant 1 : index
    %35 = vector.load %arg2[%c0_17, %c1_18] : memref<4x9xf32, #tpu.memory_space<vmem>>, vector<4x1xf32>
    %36 = vector.broadcast %35 : vector<4x1xf32> to vector<4x256xf32>
    %37 = arith.mulf %34, %36 : vector<4x256xf32>
    %38 = arith.addf %33, %37 : vector<4x256xf32>
    %c0_19 = arith.constant 0 : index
    %c2 = arith.constant 2 : index
    %39 = vector.load %arg6[%c0_19, %c2] : memref<4x290xf32, #tpu.memory_space<vmem>>, vector<4x256xf32>
    %c15_i32 = arith.constant 15 : i32
    %40 = vector.broadcast %c15_i32 : i32 to vector<1x256xi32>
    %41 = arith.cmpi slt, %23, %40 : vector<1x256xi32>
    %cst_20 = arith.constant 0.000000e+00 : f32
    %42 = vector.shape_cast %41 : vector<1x256xi1> to vector<1x256xi1>
    %43 = vector.broadcast %42 : vector<1x256xi1> to vector<4x256xi1>
    %44 = vector.broadcast %cst_20 : f32 to vector<4x256xf32>
    %45 = arith.select %43, %39, %44 : vector<4x256xi1>, vector<4x256xf32>
    %c0_21 = arith.constant 0 : index
    %c2_22 = arith.constant 2 : index
    %46 = vector.load %arg2[%c0_21, %c2_22] : memref<4x9xf32, #tpu.memory_space<vmem>>, vector<4x1xf32>
    %47 = vector.broadcast %46 : vector<4x1xf32> to vector<4x256xf32>
    %48 = arith.mulf %45, %47 : vector<4x256xf32>
    %49 = arith.addf %38, %48 : vector<4x256xf32>
    %c0_23 = arith.constant 0 : index
    %c16 = arith.constant 16 : index
    %50 = vector.load %arg6[%c0_23, %c16] : memref<4x290xf32, #tpu.memory_space<vmem>>, vector<4x256xf32>
    %c1_i32_24 = arith.constant 1 : i32
    %51 = vector.broadcast %c1_i32_24 : i32 to vector<1x256xi32>
    %52 = arith.cmpi sge, %23, %51 : vector<1x256xi32>
    %cst_25 = arith.constant 0.000000e+00 : f32
    %53 = vector.shape_cast %52 : vector<1x256xi1> to vector<1x256xi1>
    %54 = vector.broadcast %53 : vector<1x256xi1> to vector<4x256xi1>
    %55 = vector.broadcast %cst_25 : f32 to vector<4x256xf32>
    %56 = arith.select %54, %50, %55 : vector<4x256xi1>, vector<4x256xf32>
    %c0_26 = arith.constant 0 : index
    %c3 = arith.constant 3 : index
    %57 = vector.load %arg2[%c0_26, %c3] : memref<4x9xf32, #tpu.memory_space<vmem>>, vector<4x1xf32>
    %58 = vector.broadcast %57 : vector<4x1xf32> to vector<4x256xf32>
    %59 = arith.mulf %56, %58 : vector<4x256xf32>
    %60 = arith.addf %49, %59 : vector<4x256xf32>
    %c0_27 = arith.constant 0 : index
    %c17_28 = arith.constant 17 : index
    %61 = vector.load %arg6[%c0_27, %c17_28] : memref<4x290xf32, #tpu.memory_space<vmem>>, vector<4x256xf32>
    %c0_29 = arith.constant 0 : index
    %c4 = arith.constant 4 : index
    %62 = vector.load %arg2[%c0_29, %c4] : memref<4x9xf32, #tpu.memory_space<vmem>>, vector<4x1xf32>
    %63 = vector.broadcast %62 : vector<4x1xf32> to vector<4x256xf32>
    %64 = arith.mulf %61, %63 : vector<4x256xf32>
    %65 = arith.addf %60, %64 : vector<4x256xf32>
    %c0_30 = arith.constant 0 : index
    %c18 = arith.constant 18 : index
    %66 = vector.load %arg6[%c0_30, %c18] : memref<4x290xf32, #tpu.memory_space<vmem>>, vector<4x256xf32>
    %c15_i32_31 = arith.constant 15 : i32
    %67 = vector.broadcast %c15_i32_31 : i32 to vector<1x256xi32>
    %68 = arith.cmpi slt, %23, %67 : vector<1x256xi32>
    %cst_32 = arith.constant 0.000000e+00 : f32
    %69 = vector.shape_cast %68 : vector<1x256xi1> to vector<1x256xi1>
    %70 = vector.broadcast %69 : vector<1x256xi1> to vector<4x256xi1>
    %71 = vector.broadcast %cst_32 : f32 to vector<4x256xf32>
    %72 = arith.select %70, %66, %71 : vector<4x256xi1>, vector<4x256xf32>
    %c0_33 = arith.constant 0 : index
    %c5 = arith.constant 5 : index
    %73 = vector.load %arg2[%c0_33, %c5] : memref<4x9xf32, #tpu.memory_space<vmem>>, vector<4x1xf32>
    %74 = vector.broadcast %73 : vector<4x1xf32> to vector<4x256xf32>
    %75 = arith.mulf %72, %74 : vector<4x256xf32>
    %76 = arith.addf %65, %75 : vector<4x256xf32>
    %c0_34 = arith.constant 0 : index
    %c32 = arith.constant 32 : index
    %77 = vector.load %arg6[%c0_34, %c32] : memref<4x290xf32, #tpu.memory_space<vmem>>, vector<4x256xf32>
    %c1_i32_35 = arith.constant 1 : i32
    %78 = vector.broadcast %c1_i32_35 : i32 to vector<1x256xi32>
    %79 = arith.cmpi sge, %23, %78 : vector<1x256xi32>
    %cst_36 = arith.constant 0.000000e+00 : f32
    %80 = vector.shape_cast %79 : vector<1x256xi1> to vector<1x256xi1>
    %81 = vector.broadcast %80 : vector<1x256xi1> to vector<4x256xi1>
    %82 = vector.broadcast %cst_36 : f32 to vector<4x256xf32>
    %83 = arith.select %81, %77, %82 : vector<4x256xi1>, vector<4x256xf32>
    %c0_37 = arith.constant 0 : index
    %c6 = arith.constant 6 : index
    %84 = vector.load %arg2[%c0_37, %c6] : memref<4x9xf32, #tpu.memory_space<vmem>>, vector<4x1xf32>
    %85 = vector.broadcast %84 : vector<4x1xf32> to vector<4x256xf32>
    %86 = arith.mulf %83, %85 : vector<4x256xf32>
    %87 = arith.addf %76, %86 : vector<4x256xf32>
    %c0_38 = arith.constant 0 : index
    %c33 = arith.constant 33 : index
    %88 = vector.load %arg6[%c0_38, %c33] : memref<4x290xf32, #tpu.memory_space<vmem>>, vector<4x256xf32>
    %c0_39 = arith.constant 0 : index
    %c7 = arith.constant 7 : index
    %89 = vector.load %arg2[%c0_39, %c7] : memref<4x9xf32, #tpu.memory_space<vmem>>, vector<4x1xf32>
    %90 = vector.broadcast %89 : vector<4x1xf32> to vector<4x256xf32>
    %91 = arith.mulf %88, %90 : vector<4x256xf32>
    %92 = arith.addf %87, %91 : vector<4x256xf32>
    %c0_40 = arith.constant 0 : index
    %c34 = arith.constant 34 : index
    %93 = vector.load %arg6[%c0_40, %c34] : memref<4x290xf32, #tpu.memory_space<vmem>>, vector<4x256xf32>
    %c15_i32_41 = arith.constant 15 : i32
    %94 = vector.broadcast %c15_i32_41 : i32 to vector<1x256xi32>
    %95 = arith.cmpi slt, %23, %94 : vector<1x256xi32>
    %cst_42 = arith.constant 0.000000e+00 : f32
    %96 = vector.shape_cast %95 : vector<1x256xi1> to vector<1x256xi1>
    %97 = vector.broadcast %96 : vector<1x256xi1> to vector<4x256xi1>
    %98 = vector.broadcast %cst_42 : f32 to vector<4x256xf32>
    %99 = arith.select %97, %93, %98 : vector<4x256xi1>, vector<4x256xf32>
    %c0_43 = arith.constant 0 : index
    %c8 = arith.constant 8 : index
    %100 = vector.load %arg2[%c0_43, %c8] : memref<4x9xf32, #tpu.memory_space<vmem>>, vector<4x1xf32>
    %101 = vector.broadcast %100 : vector<4x1xf32> to vector<4x256xf32>
    %102 = arith.mulf %99, %101 : vector<4x256xf32>
    %103 = arith.addf %92, %102 : vector<4x256xf32>
    %104 = vector.extract_strided_slice %103 {offsets = [0, 0], sizes = [1, 256], strides = [1, 1]} : vector<4x256xf32> to vector<1x256xf32>
    %c0_44 = arith.constant 0 : index
    %c0_45 = arith.constant 0 : index
    %105 = vector.load %arg3[%c0_44, %c0_45] : memref<8x4xf32, #tpu.memory_space<vmem>>, vector<8x1xf32>
    %106 = vector.broadcast %104 : vector<1x256xf32> to vector<8x256xf32>
    %107 = vector.broadcast %105 : vector<8x1xf32> to vector<8x256xf32>
    %108 = arith.mulf %106, %107 : vector<8x256xf32>
    %109 = vector.extract_strided_slice %103 {offsets = [1, 0], sizes = [1, 256], strides = [1, 1]} : vector<4x256xf32> to vector<1x256xf32>
    %c0_46 = arith.constant 0 : index
    %c1_47 = arith.constant 1 : index
    %110 = vector.load %arg3[%c0_46, %c1_47] : memref<8x4xf32, #tpu.memory_space<vmem>>, vector<8x1xf32>
    %111 = vector.broadcast %109 : vector<1x256xf32> to vector<8x256xf32>
    %112 = vector.broadcast %110 : vector<8x1xf32> to vector<8x256xf32>
    %113 = arith.mulf %111, %112 : vector<8x256xf32>
    %114 = arith.addf %108, %113 : vector<8x256xf32>
    %115 = vector.extract_strided_slice %103 {offsets = [2, 0], sizes = [1, 256], strides = [1, 1]} : vector<4x256xf32> to vector<1x256xf32>
    %c0_48 = arith.constant 0 : index
    %c2_49 = arith.constant 2 : index
    %116 = vector.load %arg3[%c0_48, %c2_49] : memref<8x4xf32, #tpu.memory_space<vmem>>, vector<8x1xf32>
    %117 = vector.broadcast %115 : vector<1x256xf32> to vector<8x256xf32>
    %118 = vector.broadcast %116 : vector<8x1xf32> to vector<8x256xf32>
    %119 = arith.mulf %117, %118 : vector<8x256xf32>
    %120 = arith.addf %114, %119 : vector<8x256xf32>
    %121 = vector.extract_strided_slice %103 {offsets = [3, 0], sizes = [1, 256], strides = [1, 1]} : vector<4x256xf32> to vector<1x256xf32>
    %c0_50 = arith.constant 0 : index
    %c3_51 = arith.constant 3 : index
    %122 = vector.load %arg3[%c0_50, %c3_51] : memref<8x4xf32, #tpu.memory_space<vmem>>, vector<8x1xf32>
    %123 = vector.broadcast %121 : vector<1x256xf32> to vector<8x256xf32>
    %124 = vector.broadcast %122 : vector<8x1xf32> to vector<8x256xf32>
    %125 = arith.mulf %123, %124 : vector<8x256xf32>
    %126 = arith.addf %120, %125 : vector<8x256xf32>
    %c0_52 = arith.constant 0 : index
    %c0_53 = arith.constant 0 : index
    %127 = vector.load %arg4[%c0_52, %c0_53] : memref<8x1xf32, #tpu.memory_space<vmem>>, vector<8x1xf32>
    %128 = vector.broadcast %127 : vector<8x1xf32> to vector<8x256xf32>
    %129 = arith.addf %126, %128 : vector<8x256xf32>
    %cst_54 = arith.constant 0.000000e+00 : f32
    %130 = vector.broadcast %cst_54 : f32 to vector<8x256xf32>
    %131 = arith.minimumf %129, %130 : vector<8x256xf32>
    %132 = math.exp %131 : vector<8x256xf32>
    %cst_55 = arith.constant 1.000000e+00 : f32
    %133 = vector.broadcast %cst_55 : f32 to vector<8x256xf32>
    %134 = arith.subf %132, %133 : vector<8x256xf32>
    %cst_56 = arith.constant 0.000000e+00 : f32
    %135 = vector.broadcast %cst_56 : f32 to vector<8x256xf32>
    %136 = arith.cmpf ogt, %129, %135 : vector<8x256xf32>
    %137 = arith.select %136, %129, %134 : vector<8x256xi1>, vector<8x256xf32>
    %c0_57 = arith.constant 0 : index
    %c0_58 = arith.constant 0 : index
    %c0_59 = arith.constant 0 : index
    %138 = vector.load %arg5[%c0_57, %c0_58, %c0_59] : memref<1x8x256xf32, #tpu.memory_space<vmem>>, vector<1x8x256xf32>
    %139 = vector.shape_cast %138 : vector<1x8x256xf32> to vector<8x256xf32>
    %140 = vector.shape_cast %137 : vector<8x256xf32> to vector<1x8x256xf32>
    tpu.vector_store %arg5[%c0_57, %c0_58, %c0_59], %140 {strides = array<i32>} : memref<1x8x256xf32, #tpu.memory_space<vmem>>, vector<1x8x256xf32>,
    return
  }
  func.func @transform_0(%arg0: i32) -> (i32, i32, i32) {
    %c0_i32 = arith.constant 0 : i32
    %c0_i32_0 = arith.constant 0 : i32
    %c0_i32_1 = arith.constant 0 : i32
    return %arg0, %c0_i32, %c0_i32_0 : i32, i32, i32
  }
  func.func @transform_1(%arg0: i32) -> (i32, i32) {
    %c0_i32 = arith.constant 0 : i32
    %c0_i32_0 = arith.constant 0 : i32
    %c0_i32_1 = arith.constant 0 : i32
    return %c0_i32, %c0_i32_0 : i32, i32
  }
  func.func @transform_2(%arg0: i32) -> (i32, i32) {
    %c0_i32 = arith.constant 0 : i32
    %c0_i32_0 = arith.constant 0 : i32
    %c0_i32_1 = arith.constant 0 : i32
    return %c0_i32, %c0_i32_0 : i32, i32
  }
  func.func @transform_3(%arg0: i32) -> (i32, i32) {
    %c0_i32 = arith.constant 0 : i32
    %c0_i32_0 = arith.constant 0 : i32
    %c0_i32_1 = arith.constant 0 : i32
    return %c0_i32, %c0_i32_0 : i32, i32
  }
  func.func @transform_4(%arg0: i32) -> (i32, i32, i32) {
    %c0_i32 = arith.constant 0 : i32
    %c0_i32_0 = arith.constant 0 : i32
    %c0_i32_1 = arith.constant 0 : i32
    return %arg0, %c0_i32, %c0_i32_0 : i32, i32, i32
  }
}

</mosaic_0001>

<bundles_post_ra>
// kernel: tpu_custom_call.1
= control target key start
LH: loop header
LB: loop body
LE: loop exit
PB: predicated region body
PF: predicated region fallthrough
CT: control target
= control target key end

     0   :  { %9 = vsyncpa [#allocation4], 0  ;;  %s1121_s0 = inlined_call_operand.vmem [shape: f32[2,4,256], index: 0, kind: input, shape index: {}]   ;;  %s1122_s1 = inlined_call_operand.vmem [shape: f32[4,9], index: 1, kind: input, shape index: {}]   ;;  %s1123_s2 = inlined_call_operand.vmem [shape: f32[8,4], index: 2, kind: input, shape index: {}]   ;;  %s1124_s3 = inlined_call_operand.vmem [shape: f32[8,1], index: 3, kind: input, shape index: {}]   ;;  %s1125_s4 = inlined_call_operand.hbm [shape: f32[2,8,256], index: 4, kind: output, shape index: {}]  }
   0x1   :  { %11 = vsyncpa [#allocation4 + $0x1], 0  ;;  %s864_s15 = smov 0   ;;  %s866_s16 = smov 0  }
   0x2   :  { %s868_s17 = smov 0   ;;  %s870_s18 = smov 0  }
   0x3 LB: > { %s885_s19 = sadd.s32 4294967295, %s816_s18   ;;  %s660_s20 = sadd.s32 4294967294, %s816_s18   ;;  %s816_s18 = sphi %s870_s18, %s1139_s18   ;;  %s812_s17 = sphi %s868_s17, %s1138_s17   ;;  %s808_s16 = sphi %s866_s16, %s1137_s16   ;;  %s804_s15 = sphi %s864_s15, %s1136_s15  }
   0x4   : > { %s889_s21 = sadd.s32 1, %s816_s18   ;;  %s113_s22 = sadd.s32 1, %s812_s17 }
   0x5   : > { %s110_s23 = ssub.s32 %s816_s18, %s889_s21  ;;  %p123_p0 = scmp.ne.s32.totalorder %s812_s17, %s808_s16 }
   0x6   : > { %p111_p1 = scmp.eq.s32.totalorder %s110_s23, 0  ;;  %p124_p2 = scmp.eq.s32.totalorder %s885_s19, 1 }
   0x7   : > { %p129_p3 = scmp.ne.s32.totalorder %s808_s16, %s804_s15  ;;  %p130_p4 = scmp.eq.s32.totalorder %s660_s20, 1 }
   0x8   : > { %s900_s24 = scalar_select %p111_p1, %s812_s17, %s113_s22  }
   0x9   : > { %p902_p5 = por %p124_p2, %p123_p0  ;;  %p906_p6 = por %p130_p4, %p129_p3 }
   0xa   : > { %p663_p7 = scmp.ge.s32.totalorder %s816_s18, 1  ;;  %p165_p8 = scmp.lt.s32.totalorder %s816_s18, 3 }
   0xc   : > { %p166_p9 = pnand %p663_p7, %p165_p8 }
   0xd   : > { %v344_v0 = vld [vmem:[%s1122_s1] sm:$0xf] (!%p166_p9)  ;;  %v818_v1 = vmov (!%p166_p9), 4   ;;  %p191_p10 = scmp.lt.s32.totalorder (!%p166_p9), %s885_s19, 1  ;;  %v819_v2 = vmov (!%p166_p9), 1   ;;  %vm196_vm0 = vcmask (!%p166_p9), 134144   ;;  %v214_v17 = vlaneseq (!%p166_p9) }
   0xe   : > { %169 = sbr.rel (%p166_p9) target bundleno = 383 (0x17f), region = 36  ;;  %736 = vset.pattern.permute.xlu1 (!%p166_p9), %v818_v1  ;;  %735 = vset.pattern.permute.xlu0 (!%p166_p9), %v819_v2  ;;  %v431_v3 = vld [vmem:[%s1122_s1] sm:$0xf] (!%p166_p9)  ;;  %vm198_vm1 = vcmask (!%p166_p9), 273544   ;;  %v820_v4 = vmov (!%p166_p9), 0.0   ;;  %v821_v5 = vmov (!%p166_p9), 7  }
   0xf   : > { %357 = vperm.xlu1 (!%p166_p9), %736, %v344_v0   ;;  %197 = vst.msk [vmem:[#allocation2] sm:$0xf] (!%p166_p9), %vm196_vm0, %v820_v4  ;;  %s822_s10 = smov (!%p166_p9), 17   ;;  %v253_v7 = vld [vmem:[%s1122_s1] sm:$0xf] (!%p166_p9)  ;;  %v823_v8 = vmov (!%p166_p9), 0  }
  0x10   : > { %199 = vst.msk [vmem:[#allocation2 + $0x8] sm:$0xf] (!%p166_p9), %vm198_vm1, %v820_v4  ;;  %v316_v9 = vld [vmem:[%s1122_s1] sm:$0xf] (!%p166_p9)  ;;  %v824_v10 = vmov (!%p166_p9), 3   ;;  %v825_v11 = vmov (!%p166_p9), 2  }
  0x11   : > { %v403_v12 = vld [vmem:[%s1122_s1] sm:$0xf] (!%p166_p9)  ;;  %v826_v14 = vmov (!%p166_p9), 5   ;;  %v827_v15 = vmov (!%p166_p9), 8   ;;  %v828_v16 = vmov (!%p166_p9), 6   ;;  %vm209_vm2 = vcmask (!%p166_p9), 1043592  }
  0x12   : > { %v490_v13 = vld [vmem:[%s1122_s1] sm:$0xf] (!%p166_p9)  ;;  %vm210_vm3 = vcmask (!%p166_p9), 1047556   ;;  %v940_v18 = vand.u32 (!%p166_p9), 127, %v214_v17  ;;  %vm205_vm4 = vcmask (!%p166_p9), 138240   ;;  %s829_s28 = smov (!%p166_p9), 112  }
  0x13   : > { %737 = vset.pattern.permute.xlu1 (!%p166_p9), %v821_v5  ;;  %vm211_vm5 = vmor (!%p166_p9), %vm210_vm3, %vm209_vm2  ;;  %v831_v32 = vmov (!%p166_p9), 839922192   ;;  %s832_s30 = smov (!%p166_p9), 110   ;;  %s833_s5 = smov (!%p166_p9), 94   ;;  %v976_v38 = vshrl.u32 (!%p166_p9), %v214_v17, 7  ;;  %v500_v57 = vld [vmem:[%s1123_s2] sm:$0xff] (!%p166_p9) }
  0x14   : > { %444 = vperm.xlu1 (!%p166_p9), %737, %v431_v3   ;;  %v944_v22 = vadd.s32 (!%p166_p9), 128, %v940_v18  ;;  %v221_v23 = vand.u32 (!%p166_p9), 15, %v940_v18  ;;  %v267_v33 = vunpack.c.l.s4 (!%p166_p9), %v831_v32  ;;  %s835_s7 = smov (!%p166_p9), 111   ;;  %s836_s8 = smov (!%p166_p9), 127   ;;  %v564_v59 = vld [vmem:[%s1124_s3] sm:$0xff] (!%p166_p9)  ;;  %vm309_vm8 = vcmask (!%p166_p9), 1031168  }
  0x15   : > { %s192_s29 = scalar_select %p191_p10, %s885_s19, 1  ;;  %vm337_vm9 = vcmask 916480   ;;  %vm285_vm12 = vcmask 1039360   ;;  %vm396_vm13 = vcmask 900096   ;;  %vm424_vm14 = vcmask 785408  }
  0x16   : > { %v228_v24 = vand.u32 15, %v944_v22  ;;  %vm950_vm6 = vcmp.ge.s32.totalorder %v221_v23, 1  ;;  %v268_v37 = vunpack.c.0.s8 %v267_v33  ;;  %vm1024_vm10 = vcmp.lt.s32.totalorder %v221_v23, 15  ;;  %s188_s14 = sand.u32 1, %s808_s16   ;;  %s675_s22 = sshll.u32 %s885_s19, 8 }
  0x17   : > { %s674_s6 = sshll.u32 %s192_s29, 3  ;;  %s830_s29 = smov 126   ;;  %vm378_vm15 = vcmask 908288   ;;  %vm465_vm1 = vcmask 777216  }
  0x18   : > { %s195_s9 = scalar_lea.vmem %s1121_s0, %s674_s6  ;;  %738 = vset.pattern.permute.xlu1 %v823_v8  ;;  %vm960_vm7 = vcmp.ge.s32.totalorder %v228_v24, 1  ;;  %s834_s6 = smov 96   ;;  %v271_v40 = vsub.s32 %v268_v37, %v976_v38  ;;  %vm1030_vm11 = vcmp.lt.s32.totalorder %v228_v24, 15 }
  0x19   : > { %v200_v6 = vld [vmem:[%s195_s9] sm:$0xff]  ;;  %256 = vperm.xlu1 %738, %v253_v7   ;;  %s837_s9 = smov 95   ;;  %s664_s20 = sshll.u32 %s188_s14, 4 }
  0x1a   : > { %202 = vrot.lane.b32.xlu0 %v200_v6, %s822_s10  ;;  %s190_s23 = scalar_lea.vmem [#allocation3], %s664_s20  ;;  %s587_s19 = scalar_lea.sflag [#allocation4], %s188_s14 }
  0x1b   : > { %s601_s27 = sshll.u32 %s190_s23, 4  ;;  %s1081_s27 = int_to_ptr.vmem [resolvable:$true] %s601_s27 }
  0x1d   : > { %740 = vset.pattern.permute.xlu1 %v824_v10 }
  0x1e   : > { %264 = vperm.xlu0 %735, %v253_v7   ;;  %347 = vperm.xlu1 %740, %v344_v0  }
  0x22   : > { %739 = vset.pattern.permute.xlu0 %v825_v11  ;;  %741 = vset.pattern.permute.xlu1 %v826_v14 }
  0x23   : > { %319 = vperm.xlu0 %739, %v316_v9   ;;  %406 = vperm.xlu1 %741, %v403_v12  }
  0x27   : > { %743 = vset.pattern.permute.xlu0 %v827_v15  ;;  %742 = vset.pattern.permute.xlu1 %v828_v16 }
  0x28   : > { %493 = vperm.xlu0 %743, %v490_v13   ;;  %434 = vperm.xlu1 %742, %v431_v3  }
  0x2c   : > { %745 = vset.pattern.permute.xlu0 %v819_v2  ;;  %744 = vset.pattern.permute.xlu1 %v823_v8 }
  0x8c   : > { %v203_v19 = vpop.permute.xlu0 %202 }
  0x8d   : > { %v204_v20 = vrot.slane %v203_v19, 4 }
  0x8e   : > { %v358_v41 = vpop.permute.xlu1 %357 }
  0x8f   : > { %v206_v21 = vsel %vm205_vm4, %v204_v20, %v203_v19  ;;  %213 = vst.msk [vmem:[#allocation2 + $0x8] sm:$0xf] %vm196_vm0, %v204_v20  ;;  %v365_v43 = vrot.slane %v358_v41, %v271_v40  ;;  %vm483_vm0 = vcmask 769024  }
  0x90   : > { %212 = vst.msk [vmem:[#allocation2] sm:$0xff] %vm211_vm5, %v206_v21 }
  0x93   : > { %v445_v50 = vpop.permute.xlu1 %444 }
  0x94   : > { %v452_v52 = vrot.slane %v445_v50, %v271_v40 }
  0x96   : > { %v327_v26 = vld [vmem:[#allocation2 + $0x8] sm:$0xf] }
  0x97   : > { %v293_v27 = vld [vmem:[#allocation2 + $0x8] sm:$0xf]  ;;  %v954_v28 = vld [vmem:[#allocation2] sm:$0xff]  ;;  %335 = vrot.lane.b32.xlu0 %v327_v26, %s829_s28  ;;  %v534_v26 = vsub.s32 2, %v976_v38 }
  0x98   : > { %307 = vrot.lane.b32.xlu1 %v293_v27, %s830_s29  ;;  %v966_v30 = vcombine.high %v954_v28, %v954_v28  ;;  %v251_v31 = vsel %vm950_vm6, %v954_v28, 0.0  ;;  %v386_v34 = vld [vmem:[#allocation2 + $0x8] sm:$0xf]  ;;  %v367_v51 = vmul.f32 %v365_v43, %v954_v28  ;;  %v454_v53 = vmul.f32 %v452_v52, %v954_v28  ;;  %v257_v61 = vpop.permute.xlu1 %256 }
  0x99   : > { %v473_v35 = vld [vmem:[#allocation2 + $0x8] sm:$0xf]  ;;  %v259_v22 = vmul.f32 %v257_v61, %v251_v31  ;;  %v550_v27 = vsub.s32 3, %v976_v38 }
  0x9a   : > { %v252_v36 = vsel %vm960_vm7, %v966_v30, 0.0  ;;  %v414_v39 = vld [vmem:[#allocation2 + $0x8] sm:$0xf]  ;;  %v371_v54 = vcombine.high %v367_v51, %v367_v51  ;;  %v458_v60 = vcombine.high %v454_v53, %v454_v53 }
  0x9b   : > { %394 = vrot.lane.b32.xlu0 %v386_v34, %s832_s30  ;;  %v355_v45 = vld [vmem:[#allocation2 + $0x8] sm:$0xf]  ;;  %v260_v24 = vmul.f32 %v257_v61, %v252_v36 }
  0x9c   : > { %481 = vrot.lane.b32.xlu1 %v473_v35, %s833_s5  ;;  %v262_v46 = vld [vmem:[#allocation2 + $0x8] sm:$0xf]  ;;  %v368_v47 = vmul.f32 %v365_v43, %v355_v45 }
  0x9d   : > { %v265_v42 = vpop.permute.xlu0 %264  ;;  %v442_v56 = vld [vmem:[#allocation2 + $0x8] sm:$0xf]  ;;  %v348_v62 = vpop.permute.xlu1 %347 }
  0x9e   : > { %v272_v44 = vrot.slane %v265_v42, %v271_v40  ;;  %v455_v58 = vmul.f32 %v452_v52, %v442_v56 }
  0x9f   : > { %422 = vrot.lane.b32.xlu0 %v414_v39, %s834_s6 }
  0xa0   : > { %303 = vrot.lane.b32.xlu1 %v954_v28, %s830_s29  ;;  %v275_v48 = vmul.f32 %v272_v44, %v262_v46  ;;  %v274_v49 = vmul.f32 %v954_v28, %v272_v44 }
  0xa2   : > { %v278_v55 = vcombine.high %v274_v49, %v274_v49  ;;  %v1012_v63 = vpop.permute.xlu1 %406  ;;  %v320_v0 = vpop.permute.xlu0 %319 }
  0xa3   : > { %331 = vrot.lane.b32.xlu0 %v954_v28, %s829_s28 }
  0xa4   : > { %418 = vrot.lane.b32.xlu1 %v954_v28, %s834_s6 }
  0xa7   : > { %390 = vrot.lane.b32.xlu0 %v954_v28, %s832_s30  ;;  %v1014_v1 = vpop.permute.xlu1 %434  ;;  %v1016_v2 = vpop.permute.xlu0 %493 }
  0xa8   : > { %477 = vrot.lane.b32.xlu1 %v954_v28, %s833_s5 }
  0xab   : > { %283 = vrot.lane.b32.xlu0 %v275_v48, %s836_s8 }
  0xac   : > { %376 = vrot.lane.b32.xlu1 %v368_v47, %s835_s7 }
  0xaf   : > { %305 = vrot.lane.b32.xlu0 %v966_v30, %s830_s29 }
  0xb0   : > { %333 = vrot.lane.b32.xlu1 %v966_v30, %s829_s28 }
  0xb3   : > { %279 = vrot.lane.b32.xlu0 %v274_v49, %s836_s8 }
  0xb4   : > { %392 = vrot.lane.b32.xlu1 %v966_v30, %s832_s30  ;;  %s1079_s30 = scalar_lea.hbm %s1125_s4, %s675_s22 }
  0xb7   : > { %479 = vrot.lane.b32.xlu0 %v966_v30, %s833_s5  ;;  %s754_s5 = scalar_lea.vmem %s1081_s27, 256 }
  0xb8   : > { %372 = vrot.lane.b32.xlu1 %v367_v51, %s835_s7  ;;  %p755_p11 = scmp.ne.s32.totalorder %s1081_s27, %s754_s5 }
  0xba   : > { %p756_p12 = pnand %p755_p11, %p902_p5 }
  0xbb   : > { %459 = vrot.lane.b32.xlu0 %v454_v53, %s837_s9 }
  0xbc   : > { %420 = vrot.lane.b32.xlu1 %v966_v30, %s834_s6  ;;  %p757_p13 = pneg %p756_p12  ;;  %s838_s6 = smov [#allocation3]  }
  0xbf   : > { %374 = vrot.lane.b32.xlu0 %v371_v54, %s835_s7  ;;  %s758_s7 = sshll.u32 %s838_s6, 4  ;;  %s759_s7 = int_to_ptr.vmem [resolvable:$false] %s758_s7 }
  0xc0   : > { %281 = vrot.lane.b32.xlu1 %v278_v55, %s836_s8  ;;  %s760_s8 = scalar_lea.vmem %s759_s7, 512  ;;  %p761_p0 = scmp.lt.s32.totalorder %s1081_s27, %s759_s7 }
  0xc1   : > { %p762_p1 = scmp.lt.s32.totalorder %s760_s8, %s754_s5 }
  0xc3   : > { %463 = vrot.lane.b32.xlu0 %v455_v58, %s837_s9  ;;  %p763_p2 = por %p762_p1, %p761_p0 }
  0xc4   : > { %511 = vperm.xlu1 %744, %v500_v57  }
  0xc5   : > { %p764_p3 = pnand %p763_p2, %p757_p13 }
  0xc7   : > { %525 = vperm.xlu0 %745, %v500_v57  }
  0xc8   : > { %746 = vset.pattern.permute.xlu1 %v825_v11 }
  0xc9   : > { %541 = vperm.xlu1 %746, %v500_v57  }
  0xcb   : > { %748 = vset.pattern.permute.xlu0 %v823_v8 }
  0xcc   : > { %567 = vperm.xlu0 %748, %v564_v59  }
  0xcd   : > { %461 = vrot.lane.b32.xlu1 %v458_v60, %s837_s9 }
  0xce   : > { %747 = vset.pattern.permute.xlu1 %v824_v10 }
  0xd1   : > { %557 = vperm.xlu1 %747, %v500_v57  }
 0x109   : > { %v336_v4 = vpop.permute.xlu0 %335 }
 0x10a   : > { %v308_v3 = vpop.permute.xlu1 %307 }
 0x10d   : > { %v395_v6 = vpop.permute.xlu0 %394 }
 0x10e   : > { %v1018_v5 = vpop.permute.xlu1 %481 }
 0x111   : > { %v423_v8 = vpop.permute.xlu0 %422 }
 0x112   : > { %v304_v7 = vpop.permute.xlu1 %303 }
 0x115   : > { %v332_v11 = vpop.permute.xlu0 %331 }
 0x116   : > { %v419_v9 = vpop.permute.xlu1 %418 }
 0x119   : > { %v391_v12 = vpop.permute.xlu0 %390 }
 0x11a   : > { %v1020_v10 = vpop.permute.xlu1 %477 }
 0x11d   : > { %v284_v14 = vpop.permute.xlu0 %283 }
 0x11e   : > { %v377_v13 = vpop.permute.xlu1 %376 }
 0x121   : > { %v306_v16 = vpop.permute.xlu0 %305 }
 0x122   : > { %v334_v15 = vpop.permute.xlu1 %333  ;;  %v310_v32 = vsel %vm309_vm8, %v304_v7, %v306_v16  ;;  %v311_v33 = vsel %vm309_vm8, %v306_v16, %v308_v3 }
 0x123   : > { %v338_v35 = vsel %vm337_vm9, %v332_v11, %v334_v15  ;;  %v339_v37 = vsel %vm337_vm9, %v334_v15, %v336_v4  ;;  %v314_v39 = vsel %vm1024_vm10, %v310_v32, 0.0  ;;  %v315_v18 = vsel %vm1030_vm11, %v311_v33, 0.0 }
 0x124   : > { %v342_v40 = vsel %vm950_vm6, %v338_v35, 0.0  ;;  %v343_v41 = vsel %vm960_vm7, %v339_v37, 0.0  ;;  %v322_v43 = vmul.f32 %v320_v0, %v314_v39  ;;  %v323_v44 = vmul.f32 %v320_v0, %v315_v18 }
 0x125   : > { %v280_v19 = vpop.permute.xlu0 %279  ;;  %v350_v49 = vmul.f32 %v348_v62, %v342_v40  ;;  %v351_v50 = vmul.f32 %v348_v62, %v343_v41 }
 0x126   : > { %v393_v17 = vpop.permute.xlu1 %392 }
 0x127   : > { %v397_v28 = vsel %vm396_vm13, %v391_v12, %v393_v17  ;;  %v398_v31 = vsel %vm396_vm13, %v393_v17, %v395_v6 }
 0x128   : > { %v401_v54 = vsel %vm1024_vm10, %v397_v28, 0.0  ;;  %v402_v55 = vsel %vm1030_vm11, %v398_v31, 0.0 }
 0x129   : > { %v480_v21 = vpop.permute.xlu0 %479  ;;  %v409_v62 = vmul.f32 %v1012_v63, %v401_v54  ;;  %v410_v0 = vmul.f32 %v1012_v63, %v402_v55 }
 0x12a   : > { %v373_v20 = vpop.permute.xlu1 %372  ;;  %v484_v29 = vsel %vm483_vm0, %v1020_v10, %v480_v21 }
 0x12b   : > { %v488_v63 = vsel %vm1024_vm10, %v484_v29, 0.0 }
 0x12c   : > { %v496_v32 = vmul.f32 %v1016_v2, %v488_v63 }
 0x12d   : > { %v460_v23 = vpop.permute.xlu0 %459 }
 0x12e   : > { %v421_v34 = vpop.permute.xlu1 %420 }
 0x12f   : > { %v425_v30 = vsel %vm424_vm14, %v419_v9, %v421_v34  ;;  %v426_v36 = vsel %vm424_vm14, %v421_v34, %v423_v8 }
 0x130   : > { %v429_v58 = vsel %vm950_vm6, %v425_v30, 0.0  ;;  %v430_v59 = vsel %vm960_vm7, %v426_v36, 0.0 }
 0x131   : > { %v375_v53 = vpop.permute.xlu0 %374  ;;  %v437_v6 = vmul.f32 %v1014_v1, %v429_v58  ;;  %v438_v7 = vmul.f32 %v1014_v1, %v430_v59 }
 0x132   : > { %v282_v42 = vpop.permute.xlu1 %281  ;;  %v379_v60 = vsel %vm378_vm15, %v373_v20, %v375_v53  ;;  %v380_v61 = vsel %vm378_vm15, %v375_v53, %v377_v13  ;;  %v485_v13 = vsel %vm483_vm0, %v480_v21, %v1018_v5  ;;  %v503_v20 = vsub.s32 0, %v976_v38 }
 0x133   : > { %v286_v45 = vsel %vm285_vm12, %v280_v19, %v282_v42  ;;  %v287_v46 = vsel %vm285_vm12, %v282_v42, %v284_v14  ;;  %v489_v15 = vsel %vm1030_vm11, %v485_v13, 0.0  ;;  %v518_v21 = vsub.s32 1, %v976_v38 }
 0x134   : > { %v290_v47 = vadd.f32 %v286_v45, %v259_v22  ;;  %v291_v48 = vadd.f32 %v287_v46, %v260_v24  ;;  %v497_v10 = vmul.f32 %v1016_v2, %v489_v15 }
 0x135   : > { %v464_v16 = vpop.permute.xlu0 %463 }
 0x136   : > { %v324_v51 = vadd.f32 %v322_v43, %v290_v47  ;;  %v325_v52 = vadd.f32 %v323_v44, %v291_v48 }
 0x138   : > { %v352_v56 = vadd.f32 %v350_v49, %v324_v51  ;;  %v353_v57 = vadd.f32 %v351_v50, %v325_v52 }
 0x13a   : > { %v383_v3 = vadd.f32 %v379_v60, %v352_v56  ;;  %v384_v4 = vadd.f32 %v380_v61, %v353_v57 }
 0x13c   : > { %v411_v8 = vadd.f32 %v409_v62, %v383_v3  ;;  %v412_v9 = vadd.f32 %v410_v0, %v384_v4 }
 0x13e   : > { %v439_v11 = vadd.f32 %v437_v6, %v411_v8  ;;  %v440_v25 = vadd.f32 %v438_v7, %v412_v9 }
 0x143   : > { %v512_v12 = vpop.permute.xlu1 %511 }
 0x146   : > { %v526_v18 = vpop.permute.xlu0 %525 }
 0x148   : > { %v542_v14 = vpop.permute.xlu1 %541 }
 0x14b   : > { %v568_v36 = vpop.permute.xlu0 %567 }
 0x14c   : > { %v462_v1 = vpop.permute.xlu1 %461 }
 0x14d   : > { %v466_v17 = vsel %vm465_vm1, %v460_v23, %v462_v1  ;;  %v467_v19 = vsel %vm465_vm1, %v462_v1, %v464_v16 }
 0x14e   : > { %v470_v33 = vadd.f32 %v466_v17, %v439_v11  ;;  %v471_v5 = vadd.f32 %v467_v19, %v440_v25 }
 0x150   : > { %v498_v34 = vadd.f32 %v496_v32, %v470_v33  ;;  %v499_v35 = vadd.f32 %v497_v10, %v471_v5  ;;  %v558_v46 = vpop.permute.xlu1 %557 }
 0x152   : > { %v504_v37 = vrot.slane %v498_v34, %v503_v20  ;;  %v508_v39 = vrot.slane %v499_v35, %v503_v20  ;;  %v519_v23 = vrot.slane %v498_v34, %v518_v21  ;;  %v523_v22 = vrot.slane %v499_v35, %v518_v21 }
 0x153   : > { %v535_v24 = vrot.slane %v498_v34, %v534_v26  ;;  %v539_v40 = vrot.slane %v499_v35, %v534_v26  ;;  %v551_v2 = vrot.slane %v498_v34, %v550_v27  ;;  %v555_v43 = vrot.slane %v499_v35, %v550_v27 }
 0x154   : > { %v514_v41 = vmul.f32 %v512_v12, %v504_v37  ;;  %v515_v42 = vmul.f32 %v512_v12, %v508_v39  ;;  %v528_v44 = vmul.f32 %v526_v18, %v519_v23  ;;  %v529_v45 = vmul.f32 %v526_v18, %v523_v22 }
 0x155   : > { %v544_v47 = vmul.f32 %v542_v14, %v535_v24  ;;  %v545_v48 = vmul.f32 %v542_v14, %v539_v40  ;;  %v560_v38 = vmul.f32 %v558_v46, %v551_v2  ;;  %v561_v49 = vmul.f32 %v558_v46, %v555_v43 }
 0x156   : > { %v530_v28 = vadd.f32 %v528_v44, %v514_v41  ;;  %v531_v31 = vadd.f32 %v529_v45, %v515_v42 }
 0x158   : > { %v546_v50 = vadd.f32 %v544_v47, %v530_v28  ;;  %v547_v30 = vadd.f32 %v545_v48, %v531_v31 }
 0x15a   : > { %v562_v51 = vadd.f32 %v560_v38, %v546_v50  ;;  %v563_v52 = vadd.f32 %v561_v49, %v547_v30 }
 0x15c   : > { %v570_v53 = vadd.f32 %v568_v36, %v562_v51  ;;  %v571_v54 = vadd.f32 %v568_v36, %v563_v52 }
 0x15e   : > { %v572_v55 = vmin.f32 %v570_v53, 0.0  ;;  %v573_v56 = vmin.f32 %v571_v54, 0.0  ;;  %vm580_vm2 = vcmp.gt.f32.partialorder %v570_v53, 0.0  ;;  %vm581_vm3 = vcmp.gt.f32.partialorder %v571_v54, 0.0 }
 0x160   : > { %v574_v57 = vmul.f32 1.442695, %v572_v55  ;;  %v576_v58 = vmul.f32 1.442695, %v573_v56 }
 0x162   : > { %750 = vpow2.f32 %v574_v57 }
 0x163   : > { %752 = vpow2.f32 %v576_v58 }
 0x16c   : > { %v751_v59 = vpop.eup %750 }
 0x16d   : > { %v753_v60 = vpop.eup %752  ;;  %v667_v61 = vadd.f32 -1.0, %v751_v59 }
 0x16e   : > { %v668_v62 = vadd.f32 -1.0, %v753_v60 }
 0x16f   : > { %v582_v0 = vsel %vm580_vm2, %v570_v53, %v667_v61 }
 0x170   : > { %v583_v3 = vsel %vm581_vm3, %v571_v54, %v668_v62  ;;  %584 = vst [vmem:[%s190_s23] sm:$0xff] %v582_v0 }
 0x171   : > { %585 = vst [vmem:[%s190_s23 + $0x8] sm:$0xff] %v583_v3 }
 0x172   : > { %767 = shalt.err (!%p764_p3)
}
 0x173   : > { %s768_s9 = scalar_lea.hbm %s1079_s30, 256  ;;  %s772_s12 = scalar_lea.hbm %s1125_s4, 512 }
 0x174   : > { %p769_p4 = scmp.ne.s32.totalorder %s1079_s30, %s768_s9  ;;  %p773_p9 = scmp.lt.u32.totalorder %s1079_s30, %s1125_s4 }
 0x175   : > { %p774_p10 = scmp.lt.u32.totalorder %s772_s12, %s768_s9  ;;  %p776_p12 = scmp.lt.u32.totalorder %s768_s9, %s1079_s30 }
 0x176   : > { %p770_p7 = pnand %p769_p4, %p902_p5 }
 0x177   : > { %p775_p11 = por %p774_p10, %p773_p9 }
 0x178   : > { %p771_p8 = pneg %p770_p7 }
 0x179   : > { %p777_p13 = por %p776_p12, %p775_p11 }
 0x17b   : > { %p778_p0 = pnand %p777_p13, %p771_p8 }
 0x17d   : > { %781 = shalt.err (!%p778_p0)
}
 0x17e   : > { %676 = dma.vmem_to_hbm [thread:$0]  (%p902_p5), %s1081_s27, 256, %s1079_s30, %s587_s19  }
 0x17f PF: > { %p682_p1 = scmp.ge.s32.totalorder %s816_s18, 2  ;;  %s613_s20 = sand.u32 1, %s804_s15  }
 0x180   : > { %s614_s22 = scalar_lea.sflag [#allocation4], %s613_s20 }
 0x181   : > { %p679_p2 = pnand %p682_p1, %p906_p6 }
 0x183   : > { %799 = dma.done.wait (!%p679_p2), %s614_s22, 256  }
 0x184   : > { %801 = vsyncadd (!%p679_p2), %s614_s22, 4294967040  ;;  %p14_p3 = scmp.ge.s32.totalorder %s889_s21, 4   ;;  %s1136_s15 = smov %s808_s16 }
 0x185   : > { %s1137_s16 = smov %s812_s17  ;;  %s1138_s17 = smov %s900_s24 }
 0x186   : > { %s1139_s18 = smov %s889_s21  ;;  %16 = sbr.rel (!%p14_p3) target bundleno = 3 (0x3), region = 71 }
 0x18d   :  { %619 = vsyncpa [#allocation4], 1 }
 0x18e   :  { %621 = vsyncpa [#allocation4 + $0x1], 1 }

</bundles_post_ra>
